<compile_context>
chip_gen: v5e
topology: v5e:2x2
jax: 0.10.0
libtpu: 0.0.40
codegen_flags: <defaults>
</compile_context>

<pallas_src>
import numpy as np
import jax
import jax.numpy as jnp
from jax.experimental import pallas as pl
from jax.experimental.pallas import tpu as pltpu


def _upsample_matrix(n: int, scale: int = 2) -> np.ndarray:
    """1-D bilinear upsample (align_corners=False, PyTorch semantics) as an (n*scale, n) matrix."""
    m = n * scale
    U = np.zeros((m, n), dtype=np.float32)
    for d in range(m):
        src = (d + 0.5) / scale - 0.5
        src = max(src, 0.0)                       # PyTorch clamps negative source coords
        i0 = min(int(np.floor(src)), n - 1)
        frac = src - i0
        i1 = min(i0 + 1, n - 1)
        U[d, i0] += 1.0 - frac
        U[d, i1] += frac
    return U


def _upsampling_add_kernel(x_ref, skip_ref, w_ref, ut_ref, o_ref):
    # x_ref:    (Cin, Nin)     one batch element, channel-major, spatial flattened (free view)
    # skip_ref: (Cout, Nout)   lane-dense skip (Nout = Hout*Wout)
    # w_ref:    (Cout, Cin)    1x1 conv weight, f32
    # ut_ref:   (Nin, Nout)    dense bilinear upsample operator^T = kron(Uh, Uw)^T, f32
    # o_ref:    (Cout, Nout)   lane-dense output

    # 1) 1x1 conv (no bias) at LOW resolution. Exact reordering: conv and bilinear
    #    upsample are both linear & bias-free, so they commute -> 4x fewer conv FLOPs.
    y = jnp.dot(w_ref[...], x_ref[...], preferred_element_type=jnp.float32)       # (Cout, Nin)

    # 2) whole 2x bilinear upsample for all channels in ONE lane-dense MXU matmul.
    up = jnp.dot(y, ut_ref[...], preferred_element_type=jnp.float32)              # (Cout, Nout)

    # 3) InstanceNorm (eps=1e-5, affine=False, PyTorch defaults) vectorized over the
    #    channel axis; two-pass variance (centered) for numerical stability; fused
    #    skip add; one unmasked lane-dense store.
    mean = jnp.mean(up, axis=-1, keepdims=True)                                    # (Cout, 1)
    cen = up - mean
    var = jnp.mean(cen * cen, axis=-1, keepdims=True)                              # (Cout, 1)
    o_ref[...] = (cen * jax.lax.rsqrt(var + 1e-5) + skip_ref[...]).astype(o_ref.dtype)


def upsampling_add(x_nchw, skip_nchw, conv_w, scale: int = 2):
    B, Cin, Hin, Win = x_nchw.shape
    Bs, Cout, Hout, Wout = skip_nchw.shape
    assert Bs == B and Hout == Hin * scale and Wout == Win * scale
    # Conv-before-upsample is exact ONLY because the conv is 1x1, bias-free and linear.
    assert conv_w.shape == (Cout, Cin, 1, 1)
    Nin, Nout = Hin * Win, Hout * Wout

    # Wrapper glue: all free reshapes (H, W contiguous in NCHW) -- no transposes anywhere.
    x2 = x_nchw.reshape(B, Cin, Nin)
    skip2 = skip_nchw.reshape(B, Cout, Nout)
    w2 = conv_w.reshape(Cout, Cin).astype(jnp.float32)

    # Dense upsample operator: out_flat = y_flat @ kron(Uh, Uw)^T. Passed as f32 from the
    # host (256x1024x4 B = 1 MiB): exact for any scale factor, no in-kernel dtype casts.
    Uh = _upsample_matrix(Hin, scale)                        # (Hout, Hin)
    Uw = _upsample_matrix(Win, scale)                        # (Wout, Win)
    ut = jnp.asarray(np.kron(Uh, Uw).T, dtype=jnp.float32)   # (Nin, Nout)

    out = pl.pallas_call(
        _upsampling_add_kernel,
        out_shape=jax.ShapeDtypeStruct((B, Cout, Nout), x_nchw.dtype),
        grid_spec=pltpu.PrefetchScalarGridSpec(
            num_scalar_prefetch=0,
            grid=(B,),
            in_specs=[
                pl.BlockSpec((None, Cin, Nin), lambda b: (b, 0, 0)),
                pl.BlockSpec((None, Cout, Nout), lambda b: (b, 0, 0)),
                pl.BlockSpec((Cout, Cin), lambda b: (0, 0)),
                pl.BlockSpec((Nin, Nout), lambda b: (0, 0)),
            ],
            out_specs=pl.BlockSpec((None, Cout, Nout), lambda b: (b, 0, 0)),
        ),
        compiler_params=pltpu.CompilerParams(
            # Batch elements are independent -> split across v7x's 2 TensorCores.
            # On single-TC v5e/v6e this is a short serial loop (~0.35us/step overhead).
            dimension_semantics=("parallel",),
        ),
    )(x2, skip2, w2, ut)

    # TODO(synk): for large B on single-TC parts, block several batch elements per grid
    # step (or fold B into the matmul N dim) to amortize the fixed per-step overhead.
    return out.reshape(B, Cout, Hout, Wout)                  # free reshape back to NCHW


if __name__ == "__main__":
    key = jax.random.PRNGKey(0)
    k1, k2, k3 = jax.random.split(key, 3)

    B, Cin, Cout, Hin, Win, scale = 2, 8, 4, 16, 16, 2
    Hout, Wout = Hin * scale, Win * scale

    x = jax.random.normal(k1, (B, Cin, Hin, Win), jnp.float32)            # NCHW
    skip = jax.random.normal(k2, (B, Cout, Hout, Wout), jnp.float32)      # NCHW
    conv_w = jax.random.normal(k3, (Cout, Cin, 1, 1), jnp.float32) * (1.0 / np.sqrt(Cin))

    out = jax.block_until_ready(upsampling_add(x, skip, conv_w, scale))

    # plain-JAX f32 reference (upsample -> conv -> instance norm -> + skip)
    hp = jax.lax.Precision.HIGHEST
    Uh = jnp.asarray(_upsample_matrix(Hin, scale))
    Uw = jnp.asarray(_upsample_matrix(Win, scale))
    up = jnp.einsum('ph,bchw,qw->bcpq', Uh, x, Uw, precision=hp)
    conv = jnp.einsum('oi,bipq->bopq', conv_w.reshape(Cout, Cin), up, precision=hp)
    mean = conv.mean(axis=(2, 3), keepdims=True)
    var = ((conv - mean) ** 2).mean(axis=(2, 3), keepdims=True)
    ref = (conv - mean) * jax.lax.rsqrt(var + 1e-5) + skip

    assert out.shape == (B, Cout, Hout, Wout)
    err = float(jnp.max(jnp.abs(out - ref)))
    assert jnp.allclose(out, ref, atol=1e-3, rtol=1e-3), err
    print("KERNEL_OK")
</pallas_src>

<mosaic_0001>
module attributes {stable_mosaic.version = 11 : i64} {
  func.func @_upsampling_add_kernel(%arg0: i32, %arg1: memref<1x8x256xf32, #tpu.memory_space<vmem>>, %arg2: memref<1x4x1024xf32, #tpu.memory_space<vmem>>, %arg3: memref<4x8xf32, #tpu.memory_space<vmem>>, %arg4: memref<256x1024xf32, #tpu.memory_space<vmem>>, %arg5: memref<1x4x1024xf32, #tpu.memory_space<vmem>>) attributes {dimension_semantics = [#tpu.dimension_semantics<parallel>], iteration_bounds = array<i64: 2>, scalar_prefetch = 0 : i64, scratch_operands = 0 : i64, tpu.core_type = #tpu.core_type<tc>, window_params = [{transform_indices = @transform_0, window_bounds = array<i64: 1, 8, 256>}, {transform_indices = @transform_1, window_bounds = array<i64: 1, 4, 1024>}, {pipeline_mode = #tpu.pipeline_mode<synchronous>, transform_indices = @transform_2, window_bounds = array<i64: 4, 8>}, {pipeline_mode = #tpu.pipeline_mode<synchronous>, transform_indices = @transform_3, window_bounds = array<i64: 256, 1024>}, {transform_indices = @transform_4, window_bounds = array<i64: 1, 4, 1024>}]} {
    %c0 = arith.constant 0 : index
    %c0_0 = arith.constant 0 : index
    %0 = vector.load %arg3[%c0, %c0_0] : memref<4x8xf32, #tpu.memory_space<vmem>>, vector<4x8xf32>
    %c0_1 = arith.constant 0 : index
    %c0_2 = arith.constant 0 : index
    %c0_3 = arith.constant 0 : index
    %1 = vector.load %arg1[%c0_1, %c0_2, %c0_3] : memref<1x8x256xf32, #tpu.memory_space<vmem>>, vector<1x8x256xf32>
    %2 = vector.shape_cast %1 : vector<1x8x256xf32> to vector<8x256xf32>
    %cst = arith.constant dense<0.000000e+00> : vector<4x256xf32>
    %3 = tpu.matmul %0, %2, %cst {dimension_numbers = #tpu.dot_dimension_numbers<[1], [0], [0], [1], [0, 0, 1, 1], [], []>} : vector<4x8xf32>, vector<8x256xf32>, vector<4x256xf32> -> vector<4x256xf32>
    %c0_4 = arith.constant 0 : index
    %c0_5 = arith.constant 0 : index
    %4 = vector.load %arg4[%c0_4, %c0_5] : memref<256x1024xf32, #tpu.memory_space<vmem>>, vector<256x1024xf32>
    %cst_6 = arith.constant dense<0.000000e+00> : vector<4x1024xf32>
    %5 = tpu.matmul %3, %4, %cst_6 {dimension_numbers = #tpu.dot_dimension_numbers<[1], [0], [0], [1], [0, 0, 1, 1], [], []>} : vector<4x256xf32>, vector<256x1024xf32>, vector<4x1024xf32> -> vector<4x1024xf32>
    %cst_7 = arith.constant dense<0.000000e+00> : vector<4xf32>
    %6 = vector.multi_reduction <add>, %5, %cst_7 [1] : vector<4x1024xf32> to vector<4xf32>
    %7 = vector.shape_cast %6 : vector<4xf32> to vector<4x1xf32>
    %cst_8 = arith.constant 1.024000e+03 : f32
    %8 = vector.broadcast %cst_8 : f32 to vector<4x1xf32>
    %9 = arith.divf %7, %8 : vector<4x1xf32>
    %10 = vector.broadcast %9 : vector<4x1xf32> to vector<4x1024xf32>
    %11 = arith.subf %5, %10 : vector<4x1024xf32>
    %12 = arith.mulf %11, %11 : vector<4x1024xf32>
    %cst_9 = arith.constant dense<0.000000e+00> : vector<4xf32>
    %13 = vector.multi_reduction <add>, %12, %cst_9 [1] : vector<4x1024xf32> to vector<4xf32>
    %14 = vector.shape_cast %13 : vector<4xf32> to vector<4x1xf32>
    %cst_10 = arith.constant 1.024000e+03 : f32
    %15 = vector.broadcast %cst_10 : f32 to vector<4x1xf32>
    %16 = arith.divf %14, %15 : vector<4x1xf32>
    %cst_11 = arith.constant 9.99999974E-6 : f32
    %17 = vector.broadcast %cst_11 : f32 to vector<4x1xf32>
    %18 = arith.addf %16, %17 : vector<4x1xf32>
    %19 = math.rsqrt %18 : vector<4x1xf32>
    %20 = vector.broadcast %19 : vector<4x1xf32> to vector<4x1024xf32>
    %21 = arith.mulf %11, %20 : vector<4x1024xf32>
    %c0_12 = arith.constant 0 : index
    %c0_13 = arith.constant 0 : index
    %c0_14 = arith.constant 0 : index
    %22 = vector.load %arg2[%c0_12, %c0_13, %c0_14] : memref<1x4x1024xf32, #tpu.memory_space<vmem>>, vector<1x4x1024xf32>
    %23 = vector.shape_cast %22 : vector<1x4x1024xf32> to vector<4x1024xf32>
    %24 = arith.addf %21, %23 : vector<4x1024xf32>
    %c0_15 = arith.constant 0 : index
    %c0_16 = arith.constant 0 : index
    %c0_17 = arith.constant 0 : index
    %25 = vector.load %arg5[%c0_15, %c0_16, %c0_17] : memref<1x4x1024xf32, #tpu.memory_space<vmem>>, vector<1x4x1024xf32>
    %26 = vector.shape_cast %25 : vector<1x4x1024xf32> to vector<4x1024xf32>
    %27 = vector.shape_cast %24 : vector<4x1024xf32> to vector<1x4x1024xf32>
    tpu.vector_store %arg5[%c0_15, %c0_16, %c0_17], %27 {strides = array<i32>} : memref<1x4x1024xf32, #tpu.memory_space<vmem>>, vector<1x4x1024xf32>,
    return
  }
  func.func @transform_0(%arg0: i32) -> (i32, i32, i32) {
    %c0_i32 = arith.constant 0 : i32
    %c0_i32_0 = arith.constant 0 : i32
    %c0_i32_1 = arith.constant 0 : i32
    return %arg0, %c0_i32, %c0_i32_0 : i32, i32, i32
  }
  func.func @transform_1(%arg0: i32) -> (i32, i32, i32) {
    %c0_i32 = arith.constant 0 : i32
    %c0_i32_0 = arith.constant 0 : i32
    %c0_i32_1 = arith.constant 0 : i32
    return %arg0, %c0_i32, %c0_i32_0 : i32, i32, i32
  }
  func.func @transform_2(%arg0: i32) -> (i32, i32) {
    %c0_i32 = arith.constant 0 : i32
    %c0_i32_0 = arith.constant 0 : i32
    %c0_i32_1 = arith.constant 0 : i32
    return %c0_i32, %c0_i32_0 : i32, i32
  }
  func.func @transform_3(%arg0: i32) -> (i32, i32) {
    %c0_i32 = arith.constant 0 : i32
    %c0_i32_0 = arith.constant 0 : i32
    %c0_i32_1 = arith.constant 0 : i32
    return %c0_i32, %c0_i32_0 : i32, i32
  }
  func.func @transform_4(%arg0: i32) -> (i32, i32, i32) {
    %c0_i32 = arith.constant 0 : i32
    %c0_i32_0 = arith.constant 0 : i32
    %c0_i32_1 = arith.constant 0 : i32
    return %arg0, %c0_i32, %c0_i32_0 : i32, i32, i32
  }
}

</mosaic_0001>

<bundles_post_ra>
// kernel: tpu_custom_call.1
= control target key start
LH: loop header
LB: loop body
LE: loop exit
PB: predicated region body
PF: predicated region fallthrough
CT: control target
= control target key end

     0   :  { %s1742_s0 = inlined_call_operand.hbm [shape: f32[2,8,256], index: 0, kind: input, shape index: {}]   ;;  %s1743_s1 = inlined_call_operand.hbm [shape: f32[2,4,1024], index: 1, kind: input, shape index: {}]   ;;  %s1744_s2 = inlined_call_operand.hbm [shape: f32[4,8], index: 2, kind: input, shape index: {}]   ;;  %s1745_s3 = inlined_call_operand.hbm [shape: f32[256,1024], index: 3, kind: input, shape index: {}]   ;;  %s1746_s4 = inlined_call_operand.hbm [shape: f32[2,4,1024], index: 4, kind: output, shape index: {}]  }
   0x1   :  { %1747 = sst [smem:[#allocation17_spill]] %s1744_s2 }
   0x2   :  { %1748 = sst [smem:[#allocation18_spill]] %s1745_s3 }
   0x3   :  { %9 = vsyncpa [#allocation3], 0 }
   0x4   :  { %11 = vsyncpa [#allocation3 + $0x1], 0 }
   0x5   :  { %12 = vsyncpa [#allocation6], 0 }
   0x6   :  { %14 = vsyncpa [#allocation6 + $0x1], 0 }
   0x7   :  { %15 = vsyncpa [#allocation9], 0 }
   0x8   :  { %16 = vsyncpa [#allocation4], 0 }
   0x9   :  { %18 = vsyncpa [#allocation4 + $0x1], 0  ;;  %s1517_s15 = smov 0   ;;  %s1519_s16 = smov 0  }
   0xa   :  { %s1521_s17 = smov 0   ;;  %s1523_s18 = smov 0  }
   0xb LB: > { %s1538_s19 = sadd.s32 4294967295, %s1485_s18   ;;  %s1181_s20 = sadd.s32 4294967294, %s1485_s18   ;;  %s1485_s18 = sphi %s1523_s18, %s1762_s18   ;;  %s1481_s17 = sphi %s1521_s17, %s1761_s17   ;;  %s1477_s16 = sphi %s1519_s16, %s1760_s16   ;;  %s1473_s15 = sphi %s1517_s15, %s1759_s15  }
   0xc   : > { %p44_p0 = scmp.ne.s32.totalorder %s1477_s16, %s1473_s15  ;;  %p45_p1 = scmp.eq.s32.totalorder %s1538_s19, 0 }
   0xd   : > { %p136_p2 = scmp.eq.s32.totalorder %s1538_s19, 1  ;;  %p142_p3 = scmp.eq.s32.totalorder %s1181_s20, 1 }
   0xe   : > { %p1547_p4 = por %p45_p1, %p44_p0  ;;  %p1182_p5 = scmp.ge.s32.totalorder %s1485_s18, 1 }
   0xf   : > { %p1552_p6 = por %p142_p3, %p44_p0  ;;  %p149_p7 = scmp.lt.s32.totalorder %s1485_s18, 3 }
  0x10   : > { %s1751_s2 = sld [smem:[#allocation17_spill]]  ;;  %s1487_s27 = smov [#allocation7]  }
  0x11   : > { %p1560_p8 = pnand %p1182_p5, %p149_p7  ;;  %s163_s28 = sshll.u32 %s1487_s27, 4  ;;  %s164_s28 = int_to_ptr.vmem [resolvable:$true] %s163_s28 }
  0x12   : > { %s1753_s3 = sld [smem:[#allocation18_spill]]  ;;  %s1488_s6 = smov [#allocation8]  }
  0x13   : > { %p1222_p10 = pneg %p1560_p8  ;;  %s174_s7 = sshll.u32 %s1488_s6, 4  ;;  %s175_s7 = int_to_ptr.vmem [resolvable:$true] %s174_s7 }
  0x14   : > { %s1489_s8 = smov 1024   ;;  %s1490_s9 = smov 64  }
  0x15   : > { %p1223_p11 = pnand %p1222_p10, %p45_p1  ;;  %s1573_s10 = sadd.s32 1, %s1485_s18  }
  0x16   : > { %s161_s25 = sshll.u32 %s1751_s2, 4  ;;  %s28_s11 = ssub.s32 %s1485_s18, %s1573_s10  ;;  %s162_s25 = int_to_ptr.hbm [resolvable:$true] %s161_s25 }
  0x17   : > { %1225 = dma.hbm_to_vmem [thread:$0]  (!%p1223_p11), %s162_s25, 64, %s164_s28, [#allocation6]  }
  0x18   : > { %s172_s5 = sshll.u32 %s1753_s3, 4  ;;  %p29_p12 = scmp.eq.s32.totalorder %s28_s11, 0  ;;  %s173_s5 = int_to_ptr.hbm [resolvable:$true] %s172_s5 }
  0x19   : > { %1228 = dma.hbm_to_vmem [thread:$0]  (!%p1223_p11), %s173_s5, 32768, %s175_s7, [#allocation9], %s1489_s8, %s1489_s8, %s1490_s9  }
  0x1a   : > { %s31_s12 = sadd.s32 1, %s1481_s17  ;;  %p38_p13 = scmp.ne.s32.totalorder %s1481_s17, %s1477_s16 }
  0x1b   : > { %p39_p0 = scmp.eq.s32.totalorder %s1485_s18, 0  ;;  %p1242_p7 = scmp.lt.s32.totalorder %s1485_s18, 2 }
  0x1c   : > { %s1582_s13 = scalar_select %p29_p12, %s1481_s17, %s31_s12  }
  0x1d   : > { %p40_p3 = por %p39_p0, %p38_p13  ;;  %p1586_p5 = por %p136_p2, %p38_p13 }
  0x1e   : > { %1754 = sst [smem:[#allocation16_spill]] %s1582_s13  ;;  %s1592_s20 = sand.u32 1, %s1481_s17  }
  0x1f   : > { %s1186_s23 = sshll.u32 %s1592_s20, 4  ;;  %s1205_s24 = sshll.u32 %s1485_s18, 4 }
  0x20   : > { %s197_s28 = scalar_lea.hbm %s1742_s0, %s1205_s24  ;;  %s192_s29 = scalar_lea.vmem [#allocation2], %s1186_s23 }
  0x21   : > { %s201_s30 = sshll.u32 %s192_s29, 4  ;;  %s199_s5 = sshll.u32 %s197_s28, 4  ;;  %s202_s30 = int_to_ptr.vmem [resolvable:$true] %s201_s30  ;;  %s200_s5 = int_to_ptr.hbm [resolvable:$true] %s199_s5 }
  0x22   : > { %p1599_p2 = pnand %p1242_p7, %p40_p3  ;;  %s208_s7 = sand.u32 1, %s1485_s18  }
  0x23   : > { %s1189_s8 = sshll.u32 %s1592_s20, 5  ;;  %s189_s9 = scalar_lea.sflag [#allocation3], %s1592_s20 }
  0x24   : > { %s1347_s11 = sshra.s32 %s200_s5, 4  ;;  %p1351_p11 = pneg %p1599_p2  ;;  %s1348_s11 = int_to_ptr.hbm [resolvable:$true] %s1347_s11 }
  0x25   : > { %s1349_s12 = scalar_lea.hbm %s1348_s11, 16  ;;  %s1354_s25 = scalar_lea.hbm %s1742_s0, 32 }
  0x26   : > { %p1350_p10 = scmp.ne.s32.totalorder %s1348_s11, %s1349_s12  ;;  %p1355_p0 = scmp.lt.s32.totalorder %s1348_s11, %s1742_s0 }
  0x27   : > { %p1356_p3 = scmp.lt.s32.totalorder %s1354_s25, %s1349_s12 }
  0x28   : > { %p1352_p12 = pnand %p1351_p11, %p1350_p10 }
  0x29   : > { %p1357_p7 = por %p1356_p3, %p1355_p0 }
  0x2a   : > { %p1353_p13 = pneg %p1352_p12 }
  0x2c   : > { %p1358_p9 = pnand %p1357_p7, %p1353_p13 }
  0x2e   : > { %1361 = shalt.err (!%p1358_p9)
}
  0x2f   : > { %1232 = dma.hbm_to_vmem [thread:$0]  (!%p1599_p2), %s200_s5, 256, %s202_s30, %s189_s9  }
  0x30   : > { %s1206_s20 = sshll.u32 %s1485_s18, 5  ;;  %s212_s23 = scalar_lea.vmem [#allocation5], %s1189_s8 }
  0x31   : > { %s217_s3 = scalar_lea.hbm %s1743_s1, %s1206_s20  ;;  %s221_s24 = sshll.u32 %s212_s23, 4  ;;  %s222_s24 = int_to_ptr.vmem [resolvable:$true] %s221_s24 }
  0x32   : > { %s219_s13 = sshll.u32 %s217_s3, 4  ;;  %s209_s11 = scalar_lea.sflag [#allocation6], %s208_s7  ;;  %s220_s13 = int_to_ptr.hbm [resolvable:$true] %s219_s13 }
  0x33   : > { %s1377_s12 = sshra.s32 %s220_s13, 4  ;;  %s1384_s9 = scalar_lea.hbm %s1743_s1, 64  ;;  %s1378_s12 = int_to_ptr.hbm [resolvable:$true] %s1377_s12 }
  0x34   : > { %s1379_s25 = scalar_lea.hbm %s1378_s12, 32  ;;  %p1385_p13 = scmp.lt.s32.totalorder %s1378_s12, %s1743_s1 }
  0x35   : > { %p1380_p9 = scmp.ne.s32.totalorder %s1378_s12, %s1379_s25  ;;  %p1386_p0 = scmp.lt.s32.totalorder %s1384_s9, %s1379_s25 }
  0x37   : > { %p1382_p10 = pnand %p1380_p9, %p1351_p11  ;;  %p1387_p3 = por %p1386_p0, %p1385_p13 }
  0x39   : > { %p1383_p12 = pneg %p1382_p10 }
  0x3b   : > { %p1388_p7 = pnand %p1387_p3, %p1383_p12 }
  0x3d   : > { %1391 = shalt.err (!%p1388_p7)
}
  0x3e   : > { %1235 = dma.hbm_to_vmem [thread:$0]  (!%p1599_p2), %s220_s13, 512, %s222_s24, %s209_s11  }
  0x3f   : > { %230 = sbr.rel (%p1560_p8) target bundleno = 701 (0x2bd), region = 36  ;;  %s1637_s3 = sand.u32 (!%p1560_p8), 1, %s1477_s16  }
  0x40   : > { %s1193_s7 = sshll.u32 (!%p1560_p8), %s1637_s3, 4  ;;  %s233_s8 = scalar_lea.sflag (!%p1560_p8), [#allocation3], %s1637_s3 }
  0x41   : > { %s236_s28 = scalar_lea.vmem (!%p1560_p8), [#allocation2], %s1193_s7 }
  0x44   : > { %1452 = dma.done.wait (%p1547_p4), %s233_s8, 256  }
  0x45   : > { %1454 = vsyncadd (%p1547_p4), %s233_s8, 4294967040  ;;  %s242_s26 = sand.u32 1, %s1538_s19   ;;  %s1194_s13 = sshll.u32 %s1637_s3, 5 }
  0x46   : > { %s243_s6 = scalar_lea.sflag [#allocation6], %s242_s26  ;;  %s1649_s20 = scalar_lea.vmem [#allocation5], %s1194_s13 }
  0x47   : > { %1456 = dma.done.wait (%p1547_p4), %s243_s6, 512  }
  0x48   : > { %1458 = vsyncadd (%p1547_p4), %s243_s6, 4294966784 }
  0x49   : > { %1460 = dma.done.wait (%p45_p1), [#allocation6], 64  }
  0x4a   : > { %1462 = vsyncadd (%p45_p1), [#allocation6], 4294967232 }
  0x4b   : > { %1464 = dma.done.wait (%p45_p1), [#allocation9], 32768  }
  0x4c   : > { %1466 = vsyncadd (%p45_p1), [#allocation9], 4294934528  ;;  %vm290_vm0 = vcmask 64512   ;;  %v288_v0 = vld [vmem:[%s236_s28] sm:$0xff]  ;;  %v289_v1 = vld [vmem:[%s236_s28 + $0x8] sm:$0xff]  ;;  %vm910_vm1 = vcmask 1043456  }
  0x4d   : > { %v287_v2 = vld [vmem:[#allocation7] sm:$0xf]  ;;  %309 = vmatpush.msra.mxu0 %v288_v0  ;;  %329 = vmatpush.msra.mxu1 %v289_v1  ;;  %v454_v3 = vld [vmem:[#allocation8 + $0x3c0] sm:$0xff]  ;;  %v455_v5 = vld [vmem:[#allocation8 + $0x3c8] sm:$0xff]  ;;  %s1207_s21 = sshll.u32 %s1538_s19, 5  ;;  %s286_s24 = scalar_lea.vmem [#allocation10], %s1194_s13 }
  0x4e   : > { %v582_v4 = vld [vmem:[#allocation8 + $0x7c0] sm:$0xff]  ;;  %1198 = vmatmul.msk.f32.vlgmr.msra.gmra.mxu0 %vm290_vm0, %v287_v2  ;;  %1199 = vmatmul.msk.f32.vlgmr.msra.gmra.mxu1 %vm290_vm0, %v287_v2  ;;  %v583_v6 = vld [vmem:[#allocation8 + $0x7c8] sm:$0xff]  ;;  %s1064_s23 = scalar_lea.hbm %s1746_s4, %s1207_s21  ;;  %s1066_s11 = sshll.u32 %s286_s24, 4  ;;  %s1067_s11 = int_to_ptr.vmem [resolvable:$true] %s1066_s11 }
  0x4f   : > { %v446_v7 = vld [vmem:[#allocation8 + $0x380] sm:$0xff]  ;;  %590 = vmatpush.msra.mxu2 %v454_v3  ;;  %610 = vmatpush.msra.mxu3 %v582_v4  ;;  %v447_v9 = vld [vmem:[#allocation8 + $0x388] sm:$0xff]  ;;  %v456_v3 = vld [vmem:[#allocation8 + $0x3d0] sm:$0xff]  ;;  %s1068_s12 = sshll.u32 %s1064_s23, 4  ;;  %s1053_s25 = scalar_lea.sflag [#allocation4], %s1637_s3  ;;  %s1069_s12 = int_to_ptr.hbm [resolvable:$true] %s1068_s12 }
  0x50   : > { %v574_v8 = vld [vmem:[#allocation8 + $0x780] sm:$0xff]  ;;  %v575_v10 = vld [vmem:[#allocation8 + $0x788] sm:$0xff]  ;;  %630 = vmatpush.msrb.mxu0 %v455_v5  ;;  %650 = vmatpush.msrb.mxu1 %v583_v6  ;;  %v584_v4 = vld [vmem:[#allocation8 + $0x7d0] sm:$0xff]  ;;  %s1421_s30 = sshra.s32 %s1069_s12, 4  ;;  %s1427_s27 = scalar_lea.hbm %s1746_s4, 64  ;;  %s1422_s30 = int_to_ptr.hbm [resolvable:$true] %s1421_s30 }
  0x51   : > { %v438_v11 = vld [vmem:[#allocation8 + $0x340] sm:$0xff]  ;;  %591 = vmatpush.msra.mxu2 %v446_v7  ;;  %611 = vmatpush.msra.mxu3 %v574_v8  ;;  %v439_v13 = vld [vmem:[#allocation8 + $0x348] sm:$0xff]  ;;  %v457_v5 = vld [vmem:[#allocation8 + $0x3d8] sm:$0xff]  ;;  %s1423_s5 = scalar_lea.hbm %s1422_s30, 32  ;;  %p1428_p2 = scmp.lt.s32.totalorder %s1422_s30, %s1746_s4 }
  0x52   : > { %v566_v12 = vld [vmem:[#allocation8 + $0x740] sm:$0xff]  ;;  %v567_v14 = vld [vmem:[#allocation8 + $0x748] sm:$0xff]  ;;  %631 = vmatpush.msrb.mxu0 %v447_v9  ;;  %651 = vmatpush.msrb.mxu1 %v575_v10  ;;  %v585_v6 = vld [vmem:[#allocation8 + $0x7d8] sm:$0xff]  ;;  %p1424_p1 = scmp.ne.s32.totalorder %s1422_s30, %s1423_s5  ;;  %p1429_p11 = scmp.lt.s32.totalorder %s1427_s27, %s1423_s5 }
  0x53   : > { %v430_v15 = vld [vmem:[#allocation8 + $0x300] sm:$0xff]  ;;  %592 = vmatpush.msra.mxu2 %v438_v11  ;;  %612 = vmatpush.msra.mxu3 %v566_v12  ;;  %v431_v17 = vld [vmem:[#allocation8 + $0x308] sm:$0xff]  ;;  %v448_v7 = vld [vmem:[#allocation8 + $0x390] sm:$0xff] }
  0x54   : > { %v558_v16 = vld [vmem:[#allocation8 + $0x700] sm:$0xff]  ;;  %v559_v18 = vld [vmem:[#allocation8 + $0x708] sm:$0xff]  ;;  %632 = vmatpush.msrb.mxu0 %v439_v13  ;;  %652 = vmatpush.msrb.mxu1 %v567_v14  ;;  %v576_v8 = vld [vmem:[#allocation8 + $0x790] sm:$0xff]  ;;  %p1425_p4 = pnand %p1424_p1, %p1586_p5  ;;  %p1430_p9 = por %p1429_p11, %p1428_p2 }
  0x55   : > { %v422_v19 = vld [vmem:[#allocation8 + $0x2c0] sm:$0xff]  ;;  %593 = vmatpush.msra.mxu2 %v430_v15  ;;  %613 = vmatpush.msra.mxu3 %v558_v16  ;;  %v423_v21 = vld [vmem:[#allocation8 + $0x2c8] sm:$0xff]  ;;  %v449_v9 = vld [vmem:[#allocation8 + $0x398] sm:$0xff] }
  0x56   : > { %v550_v20 = vld [vmem:[#allocation8 + $0x6c0] sm:$0xff]  ;;  %v551_v22 = vld [vmem:[#allocation8 + $0x6c8] sm:$0xff]  ;;  %633 = vmatpush.msrb.mxu0 %v431_v17  ;;  %653 = vmatpush.msrb.mxu1 %v559_v18  ;;  %v577_v10 = vld [vmem:[#allocation8 + $0x798] sm:$0xff]  ;;  %p1426_p8 = pneg %p1425_p4 }
  0x57   : > { %v414_v23 = vld [vmem:[#allocation8 + $0x280] sm:$0xff]  ;;  %594 = vmatpush.msra.mxu2 %v422_v19  ;;  %614 = vmatpush.msra.mxu3 %v550_v20  ;;  %v415_v25 = vld [vmem:[#allocation8 + $0x288] sm:$0xff]  ;;  %v440_v11 = vld [vmem:[#allocation8 + $0x350] sm:$0xff] }
  0x58   : > { %v542_v24 = vld [vmem:[#allocation8 + $0x680] sm:$0xff]  ;;  %v543_v26 = vld [vmem:[#allocation8 + $0x688] sm:$0xff]  ;;  %634 = vmatpush.msrb.mxu0 %v423_v21  ;;  %654 = vmatpush.msrb.mxu1 %v551_v22  ;;  %v568_v12 = vld [vmem:[#allocation8 + $0x750] sm:$0xff]  ;;  %p1431_p10 = pnand %p1430_p9, %p1426_p8 }
  0x59   : > { %v406_v27 = vld [vmem:[#allocation8 + $0x240] sm:$0xff]  ;;  %595 = vmatpush.msra.mxu2 %v414_v23  ;;  %615 = vmatpush.msra.mxu3 %v542_v24  ;;  %v407_v29 = vld [vmem:[#allocation8 + $0x248] sm:$0xff]  ;;  %v441_v13 = vld [vmem:[#allocation8 + $0x358] sm:$0xff] }
  0x5a   : > { %v534_v28 = vld [vmem:[#allocation8 + $0x640] sm:$0xff]  ;;  %v535_v30 = vld [vmem:[#allocation8 + $0x648] sm:$0xff]  ;;  %635 = vmatpush.msrb.mxu0 %v415_v25  ;;  %655 = vmatpush.msrb.mxu1 %v543_v26  ;;  %v569_v14 = vld [vmem:[#allocation8 + $0x758] sm:$0xff] }
  0x5b   : > { %v398_v31 = vld [vmem:[#allocation8 + $0x200] sm:$0xff]  ;;  %596 = vmatpush.msra.mxu2 %v406_v27  ;;  %616 = vmatpush.msra.mxu3 %v534_v28  ;;  %v399_v33 = vld [vmem:[#allocation8 + $0x208] sm:$0xff]  ;;  %v432_v15 = vld [vmem:[#allocation8 + $0x310] sm:$0xff] }
  0x5c   : > { %v526_v32 = vld [vmem:[#allocation8 + $0x600] sm:$0xff]  ;;  %v527_v34 = vld [vmem:[#allocation8 + $0x608] sm:$0xff]  ;;  %636 = vmatpush.msrb.mxu0 %v407_v29  ;;  %656 = vmatpush.msrb.mxu1 %v535_v30  ;;  %v560_v16 = vld [vmem:[#allocation8 + $0x710] sm:$0xff] }
  0x5d   : > { %v390_v35 = vld [vmem:[#allocation8 + $0x1c0] sm:$0xff]  ;;  %597 = vmatpush.msra.mxu2 %v398_v31  ;;  %617 = vmatpush.msra.mxu3 %v526_v32  ;;  %v391_v37 = vld [vmem:[#allocation8 + $0x1c8] sm:$0xff]  ;;  %v433_v17 = vld [vmem:[#allocation8 + $0x318] sm:$0xff] }
  0x5e   : > { %v518_v36 = vld [vmem:[#allocation8 + $0x5c0] sm:$0xff]  ;;  %v519_v38 = vld [vmem:[#allocation8 + $0x5c8] sm:$0xff]  ;;  %637 = vmatpush.msrb.mxu0 %v399_v33  ;;  %657 = vmatpush.msrb.mxu1 %v527_v34  ;;  %v561_v18 = vld [vmem:[#allocation8 + $0x718] sm:$0xff] }
  0x5f   : > { %v382_v39 = vld [vmem:[#allocation8 + $0x180] sm:$0xff]  ;;  %598 = vmatpush.msra.mxu2 %v390_v35  ;;  %618 = vmatpush.msra.mxu3 %v518_v36  ;;  %v383_v41 = vld [vmem:[#allocation8 + $0x188] sm:$0xff]  ;;  %v424_v19 = vld [vmem:[#allocation8 + $0x2d0] sm:$0xff] }
  0x60   : > { %v510_v40 = vld [vmem:[#allocation8 + $0x580] sm:$0xff]  ;;  %v511_v42 = vld [vmem:[#allocation8 + $0x588] sm:$0xff]  ;;  %638 = vmatpush.msrb.mxu0 %v391_v37  ;;  %658 = vmatpush.msrb.mxu1 %v519_v38  ;;  %v552_v20 = vld [vmem:[#allocation8 + $0x6d0] sm:$0xff] }
  0x61   : > { %v374_v43 = vld [vmem:[#allocation8 + $0x140] sm:$0xff]  ;;  %599 = vmatpush.msra.mxu2 %v382_v39  ;;  %619 = vmatpush.msra.mxu3 %v510_v40  ;;  %v375_v45 = vld [vmem:[#allocation8 + $0x148] sm:$0xff]  ;;  %v425_v21 = vld [vmem:[#allocation8 + $0x2d8] sm:$0xff] }
  0x62   : > { %v502_v44 = vld [vmem:[#allocation8 + $0x540] sm:$0xff]  ;;  %v503_v46 = vld [vmem:[#allocation8 + $0x548] sm:$0xff]  ;;  %639 = vmatpush.msrb.mxu0 %v383_v41  ;;  %659 = vmatpush.msrb.mxu1 %v511_v42  ;;  %v553_v22 = vld [vmem:[#allocation8 + $0x6d8] sm:$0xff] }
  0x63   : > { %v366_v47 = vld [vmem:[#allocation8 + $0x100] sm:$0xff]  ;;  %600 = vmatpush.msra.mxu2 %v374_v43  ;;  %620 = vmatpush.msra.mxu3 %v502_v44  ;;  %v367_v49 = vld [vmem:[#allocation8 + $0x108] sm:$0xff]  ;;  %v416_v23 = vld [vmem:[#allocation8 + $0x290] sm:$0xff] }
  0x64   : > { %v494_v48 = vld [vmem:[#allocation8 + $0x500] sm:$0xff]  ;;  %v495_v50 = vld [vmem:[#allocation8 + $0x508] sm:$0xff]  ;;  %640 = vmatpush.msrb.mxu0 %v375_v45  ;;  %660 = vmatpush.msrb.mxu1 %v503_v46  ;;  %v544_v24 = vld [vmem:[#allocation8 + $0x690] sm:$0xff] }
  0x65   : > { %v358_v51 = vld [vmem:[#allocation8 + $0xc0] sm:$0xff]  ;;  %601 = vmatpush.msra.mxu2 %v366_v47  ;;  %621 = vmatpush.msra.mxu3 %v494_v48  ;;  %v359_v53 = vld [vmem:[#allocation8 + $0xc8] sm:$0xff]  ;;  %v417_v25 = vld [vmem:[#allocation8 + $0x298] sm:$0xff] }
  0x66   : > { %v486_v52 = vld [vmem:[#allocation8 + $0x4c0] sm:$0xff]  ;;  %v487_v54 = vld [vmem:[#allocation8 + $0x4c8] sm:$0xff]  ;;  %641 = vmatpush.msrb.mxu0 %v367_v49  ;;  %661 = vmatpush.msrb.mxu1 %v495_v50  ;;  %v545_v26 = vld [vmem:[#allocation8 + $0x698] sm:$0xff] }
  0x67   : > { %v350_v55 = vld [vmem:[#allocation8 + $0x80] sm:$0xff]  ;;  %602 = vmatpush.msra.mxu2 %v358_v51  ;;  %622 = vmatpush.msra.mxu3 %v486_v52  ;;  %v351_v57 = vld [vmem:[#allocation8 + $0x88] sm:$0xff]  ;;  %v408_v27 = vld [vmem:[#allocation8 + $0x250] sm:$0xff] }
  0x68   : > { %v478_v56 = vld [vmem:[#allocation8 + $0x480] sm:$0xff]  ;;  %v479_v58 = vld [vmem:[#allocation8 + $0x488] sm:$0xff]  ;;  %642 = vmatpush.msrb.mxu0 %v359_v53  ;;  %662 = vmatpush.msrb.mxu1 %v487_v54  ;;  %v536_v28 = vld [vmem:[#allocation8 + $0x650] sm:$0xff] }
  0x69   : > { %v342_v59 = vld [vmem:[#allocation8 + $0x40] sm:$0xff]  ;;  %603 = vmatpush.msra.mxu2 %v350_v55  ;;  %623 = vmatpush.msra.mxu3 %v478_v56  ;;  %v343_v61 = vld [vmem:[#allocation8 + $0x48] sm:$0xff]  ;;  %v409_v29 = vld [vmem:[#allocation8 + $0x258] sm:$0xff] }
  0x6a   : > { %v470_v60 = vld [vmem:[#allocation8 + $0x440] sm:$0xff]  ;;  %v471_v62 = vld [vmem:[#allocation8 + $0x448] sm:$0xff]  ;;  %643 = vmatpush.msrb.mxu0 %v351_v57  ;;  %663 = vmatpush.msrb.mxu1 %v479_v58  ;;  %v537_v30 = vld [vmem:[#allocation8 + $0x658] sm:$0xff] }
  0x6b   : > { %v334_v63 = vld [vmem:[#allocation8] sm:$0xff]  ;;  %604 = vmatpush.msra.mxu2 %v342_v59  ;;  %624 = vmatpush.msra.mxu3 %v470_v60  ;;  %v335_v1 = vld [vmem:[#allocation8 + $0x8] sm:$0xff]  ;;  %v400_v31 = vld [vmem:[#allocation8 + $0x210] sm:$0xff] }
  0x6c   : > { %v462_v0 = vld [vmem:[#allocation8 + $0x400] sm:$0xff]  ;;  %v463_v2 = vld [vmem:[#allocation8 + $0x408] sm:$0xff]  ;;  %644 = vmatpush.msrb.mxu0 %v343_v61  ;;  %664 = vmatpush.msrb.mxu1 %v471_v62  ;;  %v528_v32 = vld [vmem:[#allocation8 + $0x610] sm:$0xff] }
  0x6d   : > { %605 = vmatpush.msra.mxu2 %v334_v63  ;;  %625 = vmatpush.msra.mxu3 %v462_v0  ;;  %v401_v33 = vld [vmem:[#allocation8 + $0x218] sm:$0xff]  ;;  %v392_v35 = vld [vmem:[#allocation8 + $0x1d0] sm:$0xff] }
  0x6e   : > { %645 = vmatpush.msrb.mxu0 %v335_v1  ;;  %665 = vmatpush.msrb.mxu1 %v463_v2  ;;  %v529_v34 = vld [vmem:[#allocation8 + $0x618] sm:$0xff]  ;;  %v520_v36 = vld [vmem:[#allocation8 + $0x5d0] sm:$0xff] }
  0x6f   : > { %670 = vmatpush.msrb.mxu2 %v456_v3  ;;  %690 = vmatpush.msrb.mxu3 %v584_v4  ;;  %v393_v37 = vld [vmem:[#allocation8 + $0x1d8] sm:$0xff]  ;;  %v384_v39 = vld [vmem:[#allocation8 + $0x190] sm:$0xff] }
  0x70   : > { %710 = vmatpush.msra.mxu0 %v457_v5  ;;  %730 = vmatpush.msra.mxu1 %v585_v6  ;;  %v521_v38 = vld [vmem:[#allocation8 + $0x5d8] sm:$0xff]  ;;  %v512_v40 = vld [vmem:[#allocation8 + $0x590] sm:$0xff]  ;;  %v458_v5 = vld [vmem:[#allocation8 + $0x3e0] sm:$0xff] }
  0x71   : > { %671 = vmatpush.msrb.mxu2 %v448_v7  ;;  %691 = vmatpush.msrb.mxu3 %v576_v8  ;;  %v385_v41 = vld [vmem:[#allocation8 + $0x198] sm:$0xff]  ;;  %v376_v43 = vld [vmem:[#allocation8 + $0x150] sm:$0xff]  ;;  %v586_v6 = vld [vmem:[#allocation8 + $0x7e0] sm:$0xff] }
  0x72   : > { %711 = vmatpush.msra.mxu0 %v449_v9  ;;  %731 = vmatpush.msra.mxu1 %v577_v10  ;;  %v513_v42 = vld [vmem:[#allocation8 + $0x598] sm:$0xff]  ;;  %v504_v44 = vld [vmem:[#allocation8 + $0x550] sm:$0xff]  ;;  %v459_v7 = vld [vmem:[#allocation8 + $0x3e8] sm:$0xff] }
  0x73   : > { %672 = vmatpush.msrb.mxu2 %v440_v11  ;;  %692 = vmatpush.msrb.mxu3 %v568_v12  ;;  %v377_v45 = vld [vmem:[#allocation8 + $0x158] sm:$0xff]  ;;  %v368_v47 = vld [vmem:[#allocation8 + $0x110] sm:$0xff]  ;;  %v587_v8 = vld [vmem:[#allocation8 + $0x7e8] sm:$0xff] }
  0x74   : > { %712 = vmatpush.msra.mxu0 %v441_v13  ;;  %732 = vmatpush.msra.mxu1 %v569_v14  ;;  %v505_v46 = vld [vmem:[#allocation8 + $0x558] sm:$0xff]  ;;  %v496_v48 = vld [vmem:[#allocation8 + $0x510] sm:$0xff]  ;;  %v450_v9 = vld [vmem:[#allocation8 + $0x3a0] sm:$0xff] }
  0x75   : > { %673 = vmatpush.msrb.mxu2 %v432_v15  ;;  %693 = vmatpush.msrb.mxu3 %v560_v16  ;;  %v369_v49 = vld [vmem:[#allocation8 + $0x118] sm:$0xff]  ;;  %v360_v51 = vld [vmem:[#allocation8 + $0xd0] sm:$0xff]  ;;  %v578_v10 = vld [vmem:[#allocation8 + $0x7a0] sm:$0xff] }
  0x76   : > { %713 = vmatpush.msra.mxu0 %v433_v17  ;;  %733 = vmatpush.msra.mxu1 %v561_v18  ;;  %v497_v50 = vld [vmem:[#allocation8 + $0x518] sm:$0xff]  ;;  %v488_v52 = vld [vmem:[#allocation8 + $0x4d0] sm:$0xff]  ;;  %v451_v11 = vld [vmem:[#allocation8 + $0x3a8] sm:$0xff] }
  0x77   : > { %674 = vmatpush.msrb.mxu2 %v424_v19  ;;  %694 = vmatpush.msrb.mxu3 %v552_v20  ;;  %v361_v53 = vld [vmem:[#allocation8 + $0xd8] sm:$0xff]  ;;  %v352_v55 = vld [vmem:[#allocation8 + $0x90] sm:$0xff]  ;;  %v579_v12 = vld [vmem:[#allocation8 + $0x7a8] sm:$0xff] }
  0x78   : > { %714 = vmatpush.msra.mxu0 %v425_v21  ;;  %734 = vmatpush.msra.mxu1 %v553_v22  ;;  %v489_v54 = vld [vmem:[#allocation8 + $0x4d8] sm:$0xff]  ;;  %v480_v56 = vld [vmem:[#allocation8 + $0x490] sm:$0xff]  ;;  %v442_v13 = vld [vmem:[#allocation8 + $0x360] sm:$0xff] }
  0x79   : > { %675 = vmatpush.msrb.mxu2 %v416_v23  ;;  %695 = vmatpush.msrb.mxu3 %v544_v24  ;;  %v353_v57 = vld [vmem:[#allocation8 + $0x98] sm:$0xff]  ;;  %v344_v59 = vld [vmem:[#allocation8 + $0x50] sm:$0xff]  ;;  %v570_v14 = vld [vmem:[#allocation8 + $0x760] sm:$0xff] }
  0x7a   : > { %715 = vmatpush.msra.mxu0 %v417_v25  ;;  %735 = vmatpush.msra.mxu1 %v545_v26  ;;  %v481_v58 = vld [vmem:[#allocation8 + $0x498] sm:$0xff]  ;;  %v472_v60 = vld [vmem:[#allocation8 + $0x450] sm:$0xff]  ;;  %v443_v15 = vld [vmem:[#allocation8 + $0x368] sm:$0xff] }
  0x7b   : > { %676 = vmatpush.msrb.mxu2 %v408_v27  ;;  %696 = vmatpush.msrb.mxu3 %v536_v28  ;;  %v345_v61 = vld [vmem:[#allocation8 + $0x58] sm:$0xff]  ;;  %v336_v63 = vld [vmem:[#allocation8 + $0x10] sm:$0xff]  ;;  %v571_v16 = vld [vmem:[#allocation8 + $0x768] sm:$0xff] }
  0x7c   : > { %716 = vmatpush.msra.mxu0 %v409_v29  ;;  %736 = vmatpush.msra.mxu1 %v537_v30  ;;  %v473_v62 = vld [vmem:[#allocation8 + $0x458] sm:$0xff]  ;;  %v464_v0 = vld [vmem:[#allocation8 + $0x410] sm:$0xff]  ;;  %v434_v17 = vld [vmem:[#allocation8 + $0x320] sm:$0xff] }
  0x7d   : > { %677 = vmatpush.msrb.mxu2 %v400_v31  ;;  %697 = vmatpush.msrb.mxu3 %v528_v32  ;;  %v337_v1 = vld [vmem:[#allocation8 + $0x18] sm:$0xff]  ;;  %v562_v18 = vld [vmem:[#allocation8 + $0x720] sm:$0xff]  ;;  %v435_v19 = vld [vmem:[#allocation8 + $0x328] sm:$0xff] }
  0x7e   : > { %717 = vmatpush.msra.mxu0 %v401_v33  ;;  %737 = vmatpush.msra.mxu1 %v529_v34  ;;  %v465_v2 = vld [vmem:[#allocation8 + $0x418] sm:$0xff]  ;;  %v563_v20 = vld [vmem:[#allocation8 + $0x728] sm:$0xff]  ;;  %v426_v21 = vld [vmem:[#allocation8 + $0x2e0] sm:$0xff] }
  0x7f   : > { %678 = vmatpush.msrb.mxu2 %v392_v35  ;;  %698 = vmatpush.msrb.mxu3 %v520_v36  ;;  %v554_v22 = vld [vmem:[#allocation8 + $0x6e0] sm:$0xff]  ;;  %v427_v23 = vld [vmem:[#allocation8 + $0x2e8] sm:$0xff] }
  0x80   : > { %718 = vmatpush.msra.mxu0 %v393_v37  ;;  %738 = vmatpush.msra.mxu1 %v521_v38  ;;  %v555_v24 = vld [vmem:[#allocation8 + $0x6e8] sm:$0xff]  ;;  %v418_v25 = vld [vmem:[#allocation8 + $0x2a0] sm:$0xff] }
  0x81   : > { %679 = vmatpush.msrb.mxu2 %v384_v39  ;;  %699 = vmatpush.msrb.mxu3 %v512_v40  ;;  %v546_v26 = vld [vmem:[#allocation8 + $0x6a0] sm:$0xff]  ;;  %v419_v27 = vld [vmem:[#allocation8 + $0x2a8] sm:$0xff] }
  0x82   : > { %719 = vmatpush.msra.mxu0 %v385_v41  ;;  %739 = vmatpush.msra.mxu1 %v513_v42  ;;  %v547_v28 = vld [vmem:[#allocation8 + $0x6a8] sm:$0xff]  ;;  %v410_v29 = vld [vmem:[#allocation8 + $0x260] sm:$0xff] }
  0x83   : > { %680 = vmatpush.msrb.mxu2 %v376_v43  ;;  %700 = vmatpush.msrb.mxu3 %v504_v44  ;;  %v538_v30 = vld [vmem:[#allocation8 + $0x660] sm:$0xff]  ;;  %v411_v31 = vld [vmem:[#allocation8 + $0x268] sm:$0xff] }
  0x84   : > { %720 = vmatpush.msra.mxu0 %v377_v45  ;;  %740 = vmatpush.msra.mxu1 %v505_v46  ;;  %v539_v32 = vld [vmem:[#allocation8 + $0x668] sm:$0xff]  ;;  %v402_v33 = vld [vmem:[#allocation8 + $0x220] sm:$0xff] }
  0x85   : > { %681 = vmatpush.msrb.mxu2 %v368_v47  ;;  %701 = vmatpush.msrb.mxu3 %v496_v48  ;;  %v530_v34 = vld [vmem:[#allocation8 + $0x620] sm:$0xff]  ;;  %v403_v35 = vld [vmem:[#allocation8 + $0x228] sm:$0xff] }
  0x86   : > { %721 = vmatpush.msra.mxu0 %v369_v49  ;;  %741 = vmatpush.msra.mxu1 %v497_v50  ;;  %v531_v36 = vld [vmem:[#allocation8 + $0x628] sm:$0xff]  ;;  %v394_v37 = vld [vmem:[#allocation8 + $0x1e0] sm:$0xff] }
  0x87   : > { %682 = vmatpush.msrb.mxu2 %v360_v51  ;;  %702 = vmatpush.msrb.mxu3 %v488_v52  ;;  %v522_v38 = vld [vmem:[#allocation8 + $0x5e0] sm:$0xff]  ;;  %v395_v39 = vld [vmem:[#allocation8 + $0x1e8] sm:$0xff] }
  0x88   : > { %722 = vmatpush.msra.mxu0 %v361_v53  ;;  %742 = vmatpush.msra.mxu1 %v489_v54  ;;  %v523_v40 = vld [vmem:[#allocation8 + $0x5e8] sm:$0xff]  ;;  %v386_v41 = vld [vmem:[#allocation8 + $0x1a0] sm:$0xff] }
  0x89   : > { %683 = vmatpush.msrb.mxu2 %v352_v55  ;;  %703 = vmatpush.msrb.mxu3 %v480_v56  ;;  %v514_v42 = vld [vmem:[#allocation8 + $0x5a0] sm:$0xff]  ;;  %v387_v43 = vld [vmem:[#allocation8 + $0x1a8] sm:$0xff] }
  0x8a   : > { %723 = vmatpush.msra.mxu0 %v353_v57  ;;  %743 = vmatpush.msra.mxu1 %v481_v58  ;;  %v515_v44 = vld [vmem:[#allocation8 + $0x5a8] sm:$0xff]  ;;  %v378_v45 = vld [vmem:[#allocation8 + $0x160] sm:$0xff] }
  0x8b   : > { %684 = vmatpush.msrb.mxu2 %v344_v59  ;;  %704 = vmatpush.msrb.mxu3 %v472_v60  ;;  %v506_v46 = vld [vmem:[#allocation8 + $0x560] sm:$0xff]  ;;  %v379_v47 = vld [vmem:[#allocation8 + $0x168] sm:$0xff] }
  0x8c   : > { %724 = vmatpush.msra.mxu0 %v345_v61  ;;  %744 = vmatpush.msra.mxu1 %v473_v62  ;;  %v507_v48 = vld [vmem:[#allocation8 + $0x568] sm:$0xff]  ;;  %v370_v49 = vld [vmem:[#allocation8 + $0x120] sm:$0xff] }
  0x8d   : > { %685 = vmatpush.msrb.mxu2 %v336_v63  ;;  %705 = vmatpush.msrb.mxu3 %v464_v0  ;;  %v498_v50 = vld [vmem:[#allocation8 + $0x520] sm:$0xff]  ;;  %v371_v51 = vld [vmem:[#allocation8 + $0x128] sm:$0xff] }
  0x8e   : > { %725 = vmatpush.msra.mxu0 %v337_v1  ;;  %745 = vmatpush.msra.mxu1 %v465_v2  ;;  %v499_v52 = vld [vmem:[#allocation8 + $0x528] sm:$0xff]  ;;  %v362_v53 = vld [vmem:[#allocation8 + $0xe0] sm:$0xff] }
  0x8f   : > { %v490_v54 = vld [vmem:[#allocation8 + $0x4e0] sm:$0xff]  ;;  %v363_v55 = vld [vmem:[#allocation8 + $0xe8] sm:$0xff] }
  0x90   : > { %v491_v56 = vld [vmem:[#allocation8 + $0x4e8] sm:$0xff]  ;;  %v354_v57 = vld [vmem:[#allocation8 + $0xa0] sm:$0xff] }
  0x91   : > { %v482_v58 = vld [vmem:[#allocation8 + $0x4a0] sm:$0xff]  ;;  %v355_v59 = vld [vmem:[#allocation8 + $0xa8] sm:$0xff] }
  0x92   : > { %v483_v60 = vld [vmem:[#allocation8 + $0x4a8] sm:$0xff]  ;;  %v346_v61 = vld [vmem:[#allocation8 + $0x60] sm:$0xff] }
  0x93   : > { %v474_v62 = vld [vmem:[#allocation8 + $0x460] sm:$0xff]  ;;  %v347_v63 = vld [vmem:[#allocation8 + $0x68] sm:$0xff] }
  0x94   : > { %v475_v0 = vld [vmem:[#allocation8 + $0x468] sm:$0xff]  ;;  %v338_v1 = vld [vmem:[#allocation8 + $0x20] sm:$0xff] }
  0x95   : > { %v466_v2 = vld [vmem:[#allocation8 + $0x420] sm:$0xff] }
  0xcb   : > { %v1663_v3 = vpop.f32.mrf.mxu0  ;;  %v1665_v4 = vpop.f32.mrf.mxu1 }
  0xcc   : > { %606 = vmatmul.f32.vlgmr.msra.gmra.mxu2 %v1663_v3  ;;  %626 = vmatmul.f32.vlgmr.msra.gmra.mxu3 %v1665_v4 }
  0xcd   : > { %646 = vmatmul.f32.vlgmr.msrb.gmra.mxu0 %v1663_v3  ;;  %666 = vmatmul.f32.vlgmr.msrb.gmra.mxu1 %v1665_v4 }
  0xce   : > { %750 = vmatpush.msra.mxu2 %v458_v5  ;;  %770 = vmatpush.msra.mxu3 %v586_v6  ;;  %v339_v5 = vld [vmem:[#allocation8 + $0x28] sm:$0xff] }
  0xcf   : > { %790 = vmatpush.msrb.mxu0 %v459_v7  ;;  %810 = vmatpush.msrb.mxu1 %v587_v8  ;;  %v467_v6 = vld [vmem:[#allocation8 + $0x428] sm:$0xff]  ;;  %v460_v7 = vld [vmem:[#allocation8 + $0x3f0] sm:$0xff] }
  0xd0   : > { %751 = vmatpush.msra.mxu2 %v450_v9  ;;  %771 = vmatpush.msra.mxu3 %v578_v10  ;;  %v588_v8 = vld [vmem:[#allocation8 + $0x7f0] sm:$0xff]  ;;  %v461_v9 = vld [vmem:[#allocation8 + $0x3f8] sm:$0xff] }
  0xd1   : > { %791 = vmatpush.msrb.mxu0 %v451_v11  ;;  %811 = vmatpush.msrb.mxu1 %v579_v12  ;;  %v589_v10 = vld [vmem:[#allocation8 + $0x7f8] sm:$0xff]  ;;  %v452_v11 = vld [vmem:[#allocation8 + $0x3b0] sm:$0xff] }
  0xd2   : > { %752 = vmatpush.msra.mxu2 %v442_v13  ;;  %772 = vmatpush.msra.mxu3 %v570_v14  ;;  %v580_v12 = vld [vmem:[#allocation8 + $0x7b0] sm:$0xff]  ;;  %v453_v13 = vld [vmem:[#allocation8 + $0x3b8] sm:$0xff] }
  0xd3   : > { %792 = vmatpush.msrb.mxu0 %v443_v15  ;;  %812 = vmatpush.msrb.mxu1 %v571_v16  ;;  %v581_v14 = vld [vmem:[#allocation8 + $0x7b8] sm:$0xff]  ;;  %v444_v15 = vld [vmem:[#allocation8 + $0x370] sm:$0xff] }
  0xd4   : > { %753 = vmatpush.msra.mxu2 %v434_v17  ;;  %773 = vmatpush.msra.mxu3 %v562_v18  ;;  %v572_v16 = vld [vmem:[#allocation8 + $0x770] sm:$0xff]  ;;  %v445_v17 = vld [vmem:[#allocation8 + $0x378] sm:$0xff] }
  0xd5   : > { %793 = vmatpush.msrb.mxu0 %v435_v19  ;;  %813 = vmatpush.msrb.mxu1 %v563_v20  ;;  %v573_v18 = vld [vmem:[#allocation8 + $0x778] sm:$0xff]  ;;  %v436_v19 = vld [vmem:[#allocation8 + $0x330] sm:$0xff] }
  0xd6   : > { %686 = vmatmul.f32.vlgmr.msrb.gmra.mxu2 %v1663_v3  ;;  %706 = vmatmul.f32.vlgmr.msrb.gmra.mxu3 %v1665_v4  ;;  %v564_v20 = vld [vmem:[#allocation8 + $0x730] sm:$0xff] }
  0xd7   : > { %726 = vmatmul.f32.vlgmr.msra.gmra.mxu0 %v1663_v3  ;;  %746 = vmatmul.f32.vlgmr.msra.gmra.mxu1 %v1665_v4 }
  0xd8   : > { %754 = vmatpush.msra.mxu2 %v426_v21  ;;  %774 = vmatpush.msra.mxu3 %v554_v22  ;;  %v437_v21 = vld [vmem:[#allocation8 + $0x338] sm:$0xff] }
  0xd9   : > { %794 = vmatpush.msrb.mxu0 %v427_v23  ;;  %814 = vmatpush.msrb.mxu1 %v555_v24  ;;  %v565_v22 = vld [vmem:[#allocation8 + $0x738] sm:$0xff]  ;;  %v428_v23 = vld [vmem:[#allocation8 + $0x2f0] sm:$0xff] }
  0xda   : > { %755 = vmatpush.msra.mxu2 %v418_v25  ;;  %775 = vmatpush.msra.mxu3 %v546_v26  ;;  %v556_v24 = vld [vmem:[#allocation8 + $0x6f0] sm:$0xff]  ;;  %v429_v25 = vld [vmem:[#allocation8 + $0x2f8] sm:$0xff] }
  0xdb   : > { %795 = vmatpush.msrb.mxu0 %v419_v27  ;;  %815 = vmatpush.msrb.mxu1 %v547_v28  ;;  %v557_v26 = vld [vmem:[#allocation8 + $0x6f8] sm:$0xff]  ;;  %v420_v27 = vld [vmem:[#allocation8 + $0x2b0] sm:$0xff] }
  0xdc   : > { %756 = vmatpush.msra.mxu2 %v410_v29  ;;  %776 = vmatpush.msra.mxu3 %v538_v30  ;;  %v548_v28 = vld [vmem:[#allocation8 + $0x6b0] sm:$0xff]  ;;  %v421_v29 = vld [vmem:[#allocation8 + $0x2b8] sm:$0xff] }
  0xdd   : > { %796 = vmatpush.msrb.mxu0 %v411_v31  ;;  %816 = vmatpush.msrb.mxu1 %v539_v32  ;;  %v549_v30 = vld [vmem:[#allocation8 + $0x6b8] sm:$0xff]  ;;  %v412_v31 = vld [vmem:[#allocation8 + $0x270] sm:$0xff] }
  0xde   : > { %757 = vmatpush.msra.mxu2 %v402_v33  ;;  %777 = vmatpush.msra.mxu3 %v530_v34  ;;  %v540_v32 = vld [vmem:[#allocation8 + $0x670] sm:$0xff]  ;;  %v413_v33 = vld [vmem:[#allocation8 + $0x278] sm:$0xff] }
  0xdf   : > { %797 = vmatpush.msrb.mxu0 %v403_v35  ;;  %817 = vmatpush.msrb.mxu1 %v531_v36  ;;  %v541_v34 = vld [vmem:[#allocation8 + $0x678] sm:$0xff]  ;;  %v404_v35 = vld [vmem:[#allocation8 + $0x230] sm:$0xff] }
  0xe0   : > { %758 = vmatpush.msra.mxu2 %v394_v37  ;;  %778 = vmatpush.msra.mxu3 %v522_v38  ;;  %v532_v36 = vld [vmem:[#allocation8 + $0x630] sm:$0xff]  ;;  %v405_v37 = vld [vmem:[#allocation8 + $0x238] sm:$0xff] }
  0xe1   : > { %798 = vmatpush.msrb.mxu0 %v395_v39  ;;  %818 = vmatpush.msrb.mxu1 %v523_v40  ;;  %v533_v38 = vld [vmem:[#allocation8 + $0x638] sm:$0xff]  ;;  %v396_v39 = vld [vmem:[#allocation8 + $0x1f0] sm:$0xff] }
  0xe2   : > { %759 = vmatpush.msra.mxu2 %v386_v41  ;;  %779 = vmatpush.msra.mxu3 %v514_v42  ;;  %v524_v40 = vld [vmem:[#allocation8 + $0x5f0] sm:$0xff]  ;;  %v397_v41 = vld [vmem:[#allocation8 + $0x1f8] sm:$0xff] }
  0xe3   : > { %799 = vmatpush.msrb.mxu0 %v387_v43  ;;  %819 = vmatpush.msrb.mxu1 %v515_v44  ;;  %v525_v42 = vld [vmem:[#allocation8 + $0x5f8] sm:$0xff]  ;;  %v388_v43 = vld [vmem:[#allocation8 + $0x1b0] sm:$0xff] }
  0xe4   : > { %760 = vmatpush.msra.mxu2 %v378_v45  ;;  %780 = vmatpush.msra.mxu3 %v506_v46  ;;  %v516_v44 = vld [vmem:[#allocation8 + $0x5b0] sm:$0xff]  ;;  %v389_v45 = vld [vmem:[#allocation8 + $0x1b8] sm:$0xff] }
  0xe5   : > { %800 = vmatpush.msrb.mxu0 %v379_v47  ;;  %820 = vmatpush.msrb.mxu1 %v507_v48  ;;  %v517_v46 = vld [vmem:[#allocation8 + $0x5b8] sm:$0xff]  ;;  %v380_v47 = vld [vmem:[#allocation8 + $0x170] sm:$0xff] }
  0xe6   : > { %761 = vmatpush.msra.mxu2 %v370_v49  ;;  %781 = vmatpush.msra.mxu3 %v498_v50  ;;  %v508_v48 = vld [vmem:[#allocation8 + $0x570] sm:$0xff]  ;;  %v381_v49 = vld [vmem:[#allocation8 + $0x178] sm:$0xff] }
  0xe7   : > { %801 = vmatpush.msrb.mxu0 %v371_v51  ;;  %821 = vmatpush.msrb.mxu1 %v499_v52  ;;  %v509_v50 = vld [vmem:[#allocation8 + $0x578] sm:$0xff]  ;;  %v372_v51 = vld [vmem:[#allocation8 + $0x130] sm:$0xff] }
  0xe8   : > { %762 = vmatpush.msra.mxu2 %v362_v53  ;;  %782 = vmatpush.msra.mxu3 %v490_v54  ;;  %v500_v52 = vld [vmem:[#allocation8 + $0x530] sm:$0xff]  ;;  %v373_v53 = vld [vmem:[#allocation8 + $0x138] sm:$0xff] }
  0xe9   : > { %802 = vmatpush.msrb.mxu0 %v363_v55  ;;  %822 = vmatpush.msrb.mxu1 %v491_v56  ;;  %v501_v54 = vld [vmem:[#allocation8 + $0x538] sm:$0xff]  ;;  %v364_v55 = vld [vmem:[#allocation8 + $0xf0] sm:$0xff] }
  0xea   : > { %763 = vmatpush.msra.mxu2 %v354_v57  ;;  %783 = vmatpush.msra.mxu3 %v482_v58  ;;  %v492_v56 = vld [vmem:[#allocation8 + $0x4f0] sm:$0xff]  ;;  %v365_v57 = vld [vmem:[#allocation8 + $0xf8] sm:$0xff] }
  0xeb   : > { %803 = vmatpush.msrb.mxu0 %v355_v59  ;;  %823 = vmatpush.msrb.mxu1 %v483_v60  ;;  %v493_v58 = vld [vmem:[#allocation8 + $0x4f8] sm:$0xff]  ;;  %v356_v59 = vld [vmem:[#allocation8 + $0xb0] sm:$0xff] }
  0xec   : > { %764 = vmatpush.msra.mxu2 %v346_v61  ;;  %784 = vmatpush.msra.mxu3 %v474_v62  ;;  %v484_v60 = vld [vmem:[#allocation8 + $0x4b0] sm:$0xff]  ;;  %v357_v61 = vld [vmem:[#allocation8 + $0xb8] sm:$0xff] }
  0xed   : > { %804 = vmatpush.msrb.mxu0 %v347_v63  ;;  %824 = vmatpush.msrb.mxu1 %v475_v0  ;;  %v485_v62 = vld [vmem:[#allocation8 + $0x4b8] sm:$0xff]  ;;  %v348_v63 = vld [vmem:[#allocation8 + $0x70] sm:$0xff] }
  0xee   : > { %765 = vmatpush.msra.mxu2 %v338_v1  ;;  %785 = vmatpush.msra.mxu3 %v466_v2  ;;  %v476_v0 = vld [vmem:[#allocation8 + $0x470] sm:$0xff]  ;;  %v349_v1 = vld [vmem:[#allocation8 + $0x78] sm:$0xff] }
  0xef   : > { %805 = vmatpush.msrb.mxu0 %v339_v5  ;;  %825 = vmatpush.msrb.mxu1 %v467_v6  ;;  %v477_v2 = vld [vmem:[#allocation8 + $0x478] sm:$0xff]  ;;  %v340_v5 = vld [vmem:[#allocation8 + $0x30] sm:$0xff] }
  0xf0   : > { %766 = vmatmul.f32.vlgmr.msra.gmra.mxu2 %v1663_v3  ;;  %786 = vmatmul.f32.vlgmr.msra.gmra.mxu3 %v1665_v4  ;;  %v468_v6 = vld [vmem:[#allocation8 + $0x430] sm:$0xff] }
  0xf1   : > { %806 = vmatmul.f32.vlgmr.msrb.gmra.mxu0 %v1663_v3  ;;  %826 = vmatmul.f32.vlgmr.msrb.gmra.mxu1 %v1665_v4 }
  0xf2   : > { %830 = vmatpush.msrb.mxu2 %v460_v7  ;;  %850 = vmatpush.msrb.mxu3 %v588_v8  ;;  %v341_v7 = vld [vmem:[#allocation8 + $0x38] sm:$0xff] }
  0xf3   : > { %870 = vmatpush.msra.mxu0 %v461_v9  ;;  %890 = vmatpush.msra.mxu1 %v589_v10  ;;  %v469_v8 = vld [vmem:[#allocation8 + $0x438] sm:$0xff] }
  0xf4   : > { %831 = vmatpush.msrb.mxu2 %v452_v11  ;;  %851 = vmatpush.msrb.mxu3 %v580_v12 }
  0xf5   : > { %871 = vmatpush.msra.mxu0 %v453_v13  ;;  %891 = vmatpush.msra.mxu1 %v581_v14 }
  0xf6   : > { %832 = vmatpush.msrb.mxu2 %v444_v15  ;;  %852 = vmatpush.msrb.mxu3 %v572_v16 }
  0xf7   : > { %872 = vmatpush.msra.mxu0 %v445_v17  ;;  %892 = vmatpush.msra.mxu1 %v573_v18 }
  0xf8   : > { %833 = vmatpush.msrb.mxu2 %v436_v19  ;;  %853 = vmatpush.msrb.mxu3 %v564_v20 }
  0xf9   : > { %873 = vmatpush.msra.mxu0 %v437_v21  ;;  %893 = vmatpush.msra.mxu1 %v565_v22 }
  0xfa   : > { %834 = vmatpush.msrb.mxu2 %v428_v23  ;;  %854 = vmatpush.msrb.mxu3 %v556_v24 }
  0xfb   : > { %874 = vmatpush.msra.mxu0 %v429_v25  ;;  %894 = vmatpush.msra.mxu1 %v557_v26 }
  0xfc   : > { %835 = vmatpush.msrb.mxu2 %v420_v27  ;;  %855 = vmatpush.msrb.mxu3 %v548_v28 }
  0xfd   : > { %875 = vmatpush.msra.mxu0 %v421_v29  ;;  %895 = vmatpush.msra.mxu1 %v549_v30 }
  0xfe   : > { %836 = vmatpush.msrb.mxu2 %v412_v31  ;;  %856 = vmatpush.msrb.mxu3 %v540_v32 }
  0xff   : > { %876 = vmatpush.msra.mxu0 %v413_v33  ;;  %896 = vmatpush.msra.mxu1 %v541_v34 }
 0x100   : > { %837 = vmatpush.msrb.mxu2 %v404_v35  ;;  %857 = vmatpush.msrb.mxu3 %v532_v36 }
 0x101   : > { %877 = vmatpush.msra.mxu0 %v405_v37  ;;  %897 = vmatpush.msra.mxu1 %v533_v38 }
 0x102   : > { %838 = vmatpush.msrb.mxu2 %v396_v39  ;;  %858 = vmatpush.msrb.mxu3 %v524_v40 }
 0x103   : > { %878 = vmatpush.msra.mxu0 %v397_v41  ;;  %898 = vmatpush.msra.mxu1 %v525_v42 }
 0x104   : > { %839 = vmatpush.msrb.mxu2 %v388_v43  ;;  %859 = vmatpush.msrb.mxu3 %v516_v44 }
 0x105   : > { %879 = vmatpush.msra.mxu0 %v389_v45  ;;  %899 = vmatpush.msra.mxu1 %v517_v46  ;;  %v1491_v46 = vmov 1024.0  }
 0x106   : > { %840 = vmatpush.msrb.mxu2 %v380_v47  ;;  %860 = vmatpush.msrb.mxu3 %v508_v48  ;;  %1283 = vrcp.f32 %v1491_v46 }
 0x107   : > { %880 = vmatpush.msra.mxu0 %v381_v49  ;;  %900 = vmatpush.msra.mxu1 %v509_v50 }
 0x108   : > { %841 = vmatpush.msrb.mxu2 %v372_v51  ;;  %861 = vmatpush.msrb.mxu3 %v500_v52 }
 0x109   : > { %881 = vmatpush.msra.mxu0 %v373_v53  ;;  %901 = vmatpush.msra.mxu1 %v501_v54 }
 0x10a   : > { %842 = vmatpush.msrb.mxu2 %v364_v55  ;;  %862 = vmatpush.msrb.mxu3 %v492_v56 }
 0x10b   : > { %882 = vmatpush.msra.mxu0 %v365_v57  ;;  %902 = vmatpush.msra.mxu1 %v493_v58 }
 0x10c   : > { %843 = vmatpush.msrb.mxu2 %v356_v59  ;;  %863 = vmatpush.msrb.mxu3 %v484_v60  ;;  %v1284_v47 = vpop.eup %1283 }
 0x10d   : > { %883 = vmatpush.msra.mxu0 %v357_v61  ;;  %903 = vmatpush.msra.mxu1 %v485_v62  ;;  %v929_v48 = vmul.f32 1024.0, %v1284_v47  ;;  %vm933_vm2 = vweird.f32 %v1284_v47 }
 0x10e   : > { %844 = vmatpush.msrb.mxu2 %v348_v63  ;;  %864 = vmatpush.msrb.mxu3 %v476_v0 }
 0x10f   : > { %884 = vmatpush.msra.mxu0 %v349_v1  ;;  %904 = vmatpush.msra.mxu1 %v477_v2  ;;  %v930_v49 = vsub.f32 1.0, %v929_v48 }
 0x110   : > { %845 = vmatpush.msrb.mxu2 %v340_v5  ;;  %865 = vmatpush.msrb.mxu3 %v468_v6 }
 0x111   : > { %885 = vmatpush.msra.mxu0 %v341_v7  ;;  %905 = vmatpush.msra.mxu1 %v469_v8  ;;  %v931_v50 = vmul.f32 %v1284_v47, %v930_v49 }
 0x112   : > { %846 = vmatmul.f32.vlgmr.msrb.gmra.mxu2 %v1663_v3  ;;  %866 = vmatmul.f32.vlgmr.msrb.gmra.mxu3 %v1665_v4 }
 0x113   : > { %886 = vmatmul.f32.vlgmr.msra.gmra.mxu0 %v1663_v3  ;;  %906 = vmatmul.f32.vlgmr.msra.gmra.mxu1 %v1665_v4  ;;  %v932_v51 = vadd.f32 %v1284_v47, %v931_v50 }
 0x115   : > { %v934_v52 = vsel %vm933_vm2, %v1284_v47, %v932_v51 }
 0x14a   : > { %v647_v11 = vpop.f32.mrf.mxu0  ;;  %v667_v12 = vpop.f32.mrf.mxu1 }
 0x14b   : > { %v668_v18 = vadd.f32 %v667_v12, %v647_v11 }
 0x14d   : > { %v912_v3 = vsel %vm910_vm1, %v668_v18, 0.0 }
 0x14f   : > { %v607_v9 = vpop.f32.mrf.mxu2  ;;  %v627_v10 = vpop.f32.mrf.mxu3 }
 0x150   : > { %v628_v17 = vadd.f32 %v627_v10, %v607_v9 }
 0x152   : > { %v911_v20 = vsel %vm910_vm1, %v628_v17, 0.0 }
 0x153   : > { %v913_v23 = vadd.f32 %v912_v3, %v911_v20 }
 0x154   : > { %v727_v15 = vpop.f32.mrf.mxu0  ;;  %v747_v16 = vpop.f32.mrf.mxu1 }
 0x155   : > { %v748_v26 = vadd.f32 %v747_v16, %v727_v15 }
 0x157   : > { %v916_v29 = vsel %vm910_vm1, %v748_v26, 0.0 }
 0x159   : > { %v687_v13 = vpop.f32.mrf.mxu2  ;;  %v707_v14 = vpop.f32.mrf.mxu3 }
 0x15a   : > { %v708_v19 = vadd.f32 %v707_v14, %v687_v13 }
 0x15c   : > { %v914_v4 = vsel %vm910_vm1, %v708_v19, 0.0 }
 0x15d   : > { %v915_v28 = vadd.f32 %v914_v4, %v913_v23  ;;  %v989_v4 = vld [vmem:[%s1649_s20] sm:$0xff]  ;;  %v990_v23 = vld [vmem:[%s1649_s20 + $0x8] sm:$0xff] }
 0x15e   : > { %997 = vst [vmem:[#allocation1] ss:$2 sm:$0xff] %v989_v4 }
 0x15f   : > { %v917_v31 = vadd.f32 %v916_v29, %v915_v28  ;;  %999 = vst [vmem:[#allocation1 + $0x10] ss:$2 sm:$0xff] %v990_v23 }
 0x165   : > { %v1004_v48 = vld.sshfl [vmem:[#allocation1] sm:$0xff pattern:$0x75316420] }
 0x166   : > { %v1006_v49 = vld.sshfl [vmem:[#allocation1 + $0x10] sm:$0xff pattern:$0x75316420] }
 0x16e   : > { %v807_v24 = vpop.f32.mrf.mxu0  ;;  %v827_v25 = vpop.f32.mrf.mxu1 }
 0x16f   : > { %v828_v32 = vadd.f32 %v827_v25, %v807_v24  ;;  %v991_v24 = vld [vmem:[%s1649_s20 + $0x10] sm:$0xff]  ;;  %v992_v25 = vld [vmem:[%s1649_s20 + $0x18] sm:$0xff] }
 0x170   : > { %1001 = vst [vmem:[#allocation1 + $0x20] ss:$2 sm:$0xff] %v991_v24 }
 0x171   : > { %v920_v38 = vsel %vm910_vm1, %v828_v32, 0.0  ;;  %1003 = vst [vmem:[#allocation1 + $0x30] ss:$2 sm:$0xff] %v992_v25 }
 0x173   : > { %v767_v21 = vpop.f32.mrf.mxu2  ;;  %v787_v22 = vpop.f32.mrf.mxu3 }
 0x174   : > { %v788_v27 = vadd.f32 %v787_v22, %v767_v21 }
 0x176   : > { %v918_v30 = vsel %vm910_vm1, %v788_v27, 0.0 }
 0x177   : > { %v919_v33 = vadd.f32 %v918_v30, %v917_v31  ;;  %v1008_v50 = vld.sshfl [vmem:[#allocation1 + $0x20] sm:$0xff pattern:$0x75316420] }
 0x178   : > { %v1010_v51 = vld.sshfl [vmem:[#allocation1 + $0x30] sm:$0xff pattern:$0x75316420] }
 0x179   : > { %v921_v41 = vadd.f32 %v920_v38, %v919_v33 }
 0x190   : > { %v887_v34 = vpop.f32.mrf.mxu0  ;;  %v907_v35 = vpop.f32.mrf.mxu1 }
 0x191   : > { %v908_v39 = vadd.f32 %v907_v35, %v887_v34 }
 0x193   : > { %v924_v44 = vsel %vm910_vm1, %v908_v39, 0.0 }
 0x195   : > { %v847_v36 = vpop.f32.mrf.mxu2  ;;  %v867_v37 = vpop.f32.mrf.mxu3 }
 0x196   : > { %v868_v40 = vadd.f32 %v867_v37, %v847_v36  ;;  %v1005_v36 = vld.sshfl [vmem:[#allocation1 + $0x8] sm:$0xff pattern:$0x75316420]  ;;  %v1007_v37 = vld.sshfl [vmem:[#allocation1 + $0x18] sm:$0xff pattern:$0x75316420] }
 0x198   : > { %v922_v42 = vsel %vm910_vm1, %v868_v40, 0.0 }
 0x199   : > { %v923_v43 = vadd.f32 %v922_v42, %v921_v41  ;;  %v1009_v42 = vld.sshfl [vmem:[#allocation1 + $0x28] sm:$0xff pattern:$0x75316420] }
 0x19b   : > { %v925_v45 = vadd.f32 %v924_v44, %v923_v43  ;;  %v1011_v43 = vld.sshfl [vmem:[#allocation1 + $0x38] sm:$0xff pattern:$0x75316420] }
 0x19d   : > { %926 = vadd.xlane.f32.xlu0 %v925_v45 }
 0x210   : > { %v927_v53 = vpop.xlane.xlu0 %926 }
 0x211   : > { %v935_v54 = vmul.f32 %v934_v52, %v927_v53 }
 0x213   : > { %v936_v55 = vsub.f32 %v628_v17, %v935_v54  ;;  %v937_v56 = vsub.f32 %v668_v18, %v935_v54  ;;  %v938_v57 = vsub.f32 %v708_v19, %v935_v54  ;;  %v939_v58 = vsub.f32 %v748_v26, %v935_v54 }
 0x214   : > { %v940_v59 = vsub.f32 %v788_v27, %v935_v54  ;;  %v941_v63 = vsub.f32 %v828_v32, %v935_v54  ;;  %v942_v6 = vsub.f32 %v868_v40, %v935_v54  ;;  %v943_v10 = vsub.f32 %v908_v39, %v935_v54 }
 0x215   : > { %v944_v60 = vmul.f32 %v936_v55, %v936_v55  ;;  %v945_v61 = vmul.f32 %v937_v56, %v937_v56  ;;  %v946_v62 = vmul.f32 %v938_v57, %v938_v57  ;;  %v947_v0 = vmul.f32 %v939_v58, %v939_v58 }
 0x216   : > { %v948_v7 = vmul.f32 %v940_v59, %v940_v59  ;;  %v949_v11 = vmul.f32 %v941_v63, %v941_v63  ;;  %v950_v14 = vmul.f32 %v942_v6, %v942_v6  ;;  %v951_v17 = vmul.f32 %v943_v10, %v943_v10 }
 0x217   : > { %v952_v1 = vsel %vm910_vm1, %v944_v60, 0.0  ;;  %v953_v2 = vsel %vm910_vm1, %v945_v61, 0.0  ;;  %v955_v8 = vsel %vm910_vm1, %v946_v62, 0.0  ;;  %v957_v12 = vsel %vm910_vm1, %v947_v0, 0.0 }
 0x218   : > { %v954_v5 = vadd.f32 %v953_v2, %v952_v1  ;;  %v959_v15 = vsel %vm910_vm1, %v948_v7, 0.0  ;;  %v961_v18 = vsel %vm910_vm1, %v949_v11, 0.0  ;;  %v963_v20 = vsel %vm910_vm1, %v950_v14, 0.0 }
 0x219   : > { %v965_v22 = vsel %vm910_vm1, %v951_v17, 0.0 }
 0x21a   : > { %v956_v9 = vadd.f32 %v955_v8, %v954_v5 }
 0x21c   : > { %v958_v13 = vadd.f32 %v957_v12, %v956_v9 }
 0x21e   : > { %v960_v16 = vadd.f32 %v959_v15, %v958_v13 }
 0x220   : > { %v962_v19 = vadd.f32 %v961_v18, %v960_v16 }
 0x222   : > { %v964_v21 = vadd.f32 %v963_v20, %v962_v19 }
 0x224   : > { %v966_v3 = vadd.f32 %v965_v22, %v964_v21 }
 0x226   : > { %967 = vadd.xlane.f32.xlu0 %v966_v3 }
 0x299   : > { %v968_v26 = vpop.xlane.xlu0 %967 }
 0x29a   : > { %v969_v27 = vmul.f32 %v968_v26, %v934_v52 }
 0x29c   : > { %v970_v28 = vadd.f32 1e-05, %v969_v27 }
 0x29e   : > { %1285 = vrsqrt.f32 %v970_v28  ;;  %vm977_vm4 = vweird.f32 %v970_v28 }
 0x2a4   : > { %v1286_v29 = vpop.eup %1285 }
 0x2a5   : > { %v972_v30 = vmul.f32 %v1286_v29, %v970_v28  ;;  %vm978_vm3 = vweird.f32 %v1286_v29 }
 0x2a6   : > { %vm979_vm5 = vmor %vm977_vm4, %vm978_vm3 }
 0x2a7   : > { %v973_v31 = vmul.f32 %v1286_v29, %v972_v30 }
 0x2a9   : > { %v974_v32 = vmul.f32 0.5, %v973_v31 }
 0x2ab   : > { %v975_v33 = vsub.f32 1.5, %v974_v32 }
 0x2ad   : > { %v976_v34 = vmul.f32 %v1286_v29, %v975_v33 }
 0x2af   : > { %v980_v35 = vsel %vm979_vm5, %v1286_v29, %v976_v34 }
 0x2b0   : > { %v981_v38 = vmul.f32 %v980_v35, %v936_v55  ;;  %v982_v39 = vmul.f32 %v980_v35, %v937_v56  ;;  %v983_v40 = vmul.f32 %v980_v35, %v938_v57  ;;  %v984_v41 = vmul.f32 %v980_v35, %v939_v58 }
 0x2b1   : > { %v985_v44 = vmul.f32 %v980_v35, %v940_v59  ;;  %v986_v45 = vmul.f32 %v980_v35, %v941_v63  ;;  %v987_v46 = vmul.f32 %v980_v35, %v942_v6  ;;  %v988_v47 = vmul.f32 %v980_v35, %v943_v10 }
 0x2b2   : > { %v1021_v52 = vadd.f32 %v1005_v36, %v982_v39  ;;  %v1023_v53 = vadd.f32 %v1007_v37, %v984_v41  ;;  %v1020_v56 = vadd.f32 %v1004_v48, %v981_v38  ;;  %v1022_v57 = vadd.f32 %v1006_v49, %v983_v40 }
 0x2b3   : > { %v1025_v54 = vadd.f32 %v1009_v42, %v986_v45  ;;  %v1027_v55 = vadd.f32 %v1011_v43, %v988_v47  ;;  %v1024_v60 = vadd.f32 %v1008_v50, %v985_v44  ;;  %v1026_v61 = vadd.f32 %v1010_v51, %v987_v46 }
 0x2b4   : > { %v1036_v58 = vrot.slane %v1021_v52, 4  ;;  %v1037_v59 = vrot.slane %v1023_v53, 4 }
 0x2b5   : > { %v1038_v62 = vrot.slane %v1025_v54, 4  ;;  %v1039_v63 = vrot.slane %v1027_v55, 4 }
 0x2b6   : > { %v1040_v0 = vsel %vm910_vm1, %v1020_v56, %v1036_v58  ;;  %v1041_v1 = vsel %vm910_vm1, %v1022_v57, %v1037_v59 }
 0x2b7   : > { %v1042_v2 = vsel %vm910_vm1, %v1024_v60, %v1038_v62  ;;  %v1043_v5 = vsel %vm910_vm1, %v1026_v61, %v1039_v63  ;;  %1048 = vst [vmem:[%s286_s24] sm:$0xff] %v1040_v0 }
 0x2b8   : > { %1049 = vst [vmem:[%s286_s24 + $0x8] sm:$0xff] %v1041_v1 }
 0x2b9   : > { %1050 = vst [vmem:[%s286_s24 + $0x10] sm:$0xff] %v1042_v2 }
 0x2ba   : > { %1051 = vst [vmem:[%s286_s24 + $0x18] sm:$0xff] %v1043_v5 }
 0x2bb   : > { %1434 = shalt.err (!%p1431_p10)
}
 0x2bc   : > { %1220 = dma.vmem_to_hbm [thread:$0]  (%p1586_p5), %s1067_s11, 512, %s1069_s12, %s1053_s25  }
 0x2bd PF: > { %s1080_s3 = sand.u32 1, %s1473_s15   ;;  %p1757_p12 = scmp.ge.s32.totalorder %s1485_s18, 2 }
 0x2be   : > { %s1081_s28 = scalar_lea.sflag [#allocation4], %s1080_s3 }
 0x2bf   : > { %p1237_p13 = pnand %p1757_p12, %p1552_p6 }
 0x2c1   : > { %p1238_p0 = pneg %p1237_p13 }
 0x2c3   : > { %1468 = dma.done.wait (%p1238_p0), %s1081_s28, 512  }
 0x2c4   : > { %1470 = vsyncadd (%p1238_p0), %s1081_s28, 4294966784  ;;  %s1758_s26 = sld [smem:[#allocation16_spill]]  ;;  %p21_p3 = scmp.ge.s32.totalorder %s1573_s10, 4  }
 0x2c5   : > { %s1759_s15 = smov %s1477_s16  ;;  %s1760_s16 = smov %s1481_s17 }
 0x2c6   : > { %s1762_s18 = smov %s1573_s10  ;;  %23 = sbr.rel (!%p21_p3) target bundleno = 11 (0xb), region = 105 }
 0x2ca   : > { %s1761_s17 = smov %s1758_s26 }
 0x2cb   :  { %1087 = vsyncpa [#allocation3], 1 }
 0x2cc   :  { %1089 = vsyncpa [#allocation3 + $0x1], 1 }
 0x2cd   :  { %1090 = vsyncpa [#allocation6], 1 }
 0x2ce   :  { %1092 = vsyncpa [#allocation6 + $0x1], 1 }
 0x2cf   :  { %1093 = vsyncpa [#allocation9], 1 }
 0x2d0   :  { %1094 = vsyncpa [#allocation4], 1 }
 0x2d1   :  { %1096 = vsyncpa [#allocation4 + $0x1], 1 }

</bundles_post_ra>
